<compile_context>
chip_gen: v7x
topology: tpu7x:2x2x1
jax: 0.10.0
libtpu: 0.0.40
codegen_flags: <defaults>
</compile_context>

<pallas_src>
import functools

import jax
import jax.numpy as jnp
from jax.experimental import pallas as pl
from jax.experimental.pallas import tpu as pltpu


def _device_kind() -> str:
    try:
        return jax.devices()[0].device_kind.lower()
    except Exception:
        return ""


def _has_two_tensorcores() -> bool:
    # v7x: 2 TensorCores per chip; v4/v5p: megacore (2 TCs fused).
    kind = _device_kind()
    return any(tag in kind for tag in ("v7", "v5p", "v4"))


def _is_v5e() -> bool:
    kind = _device_kind()
    return ("v5e" in kind) or ("v5 lite" in kind) or ("v5lite" in kind)


def _sublane_multiple(dtype) -> int:
    # f32 -> 8 rows per vreg, bf16 -> 16, int8/fp8 -> 32.
    return 8 * max(1, 4 // jnp.dtype(dtype).itemsize)


def _round_up(x: int, m: int) -> int:
    return (x + m - 1) // m * m


def _pick_num_blocks(n: int, per_image_scratch_bytes: int) -> int:
    """Fewest grid steps that (a) feed both TCs on 2-core chips, (b) keep the
    per-step scratch under ~8 MiB, (c) bound the per-step Python unroll and
    (d) divide N evenly."""
    min_parallel = 2 if (_has_two_tensorcores() and n >= 2) else 1
    budget = 8 * 1024 * 1024
    min_vmem = -(-(n * per_image_scratch_bytes) // budget)     # ceil div
    min_unroll = -(-n // 8)                                    # <= 8 images/step
    target = min(max(min_parallel, min_vmem, min_unroll, 1), n)
    for nblk in range(target, n + 1):
        if n % nblk == 0:
            return nblk
    return n


def _apply_activation(y, activation, gelu_approximate):
    if activation == "relu":
        return jnp.maximum(y, 0.0)
    if activation == "gelu":
        return jax.nn.gelu(y, approximate=gelu_approximate)
    if activation == "hardswish":
        return y * jnp.clip(y + 3.0, 0.0, 6.0) * (1.0 / 6.0)
    if activation == "tanh":
        return jnp.tanh(y)
    if activation == "sigmoid":
        return jax.nn.sigmoid(y)
    return y


def _conv_layer_kernel(x_ref, w_ref, b_ref, sc_ref, sh_ref, o_ref,
                       xflat_ref, xcol_ref, *,
                       H, W, K, nb, cin, cin_pad, cout, activation,
                       add_bias, gelu_approximate, cat_input):
    """One batch tile (nb images) per grid step, channel-first / flat-spatial.

    x_ref    : (nb, Cin, H*W)                 images, lane axis = H*W
    w_ref    : (Cout, K*K*Cin_pad)            weight, tap-major, zero-pad cols
    b_ref    : (Cout, 1)                      conv bias (unused if add_bias=0)
    sc_ref   : (Cout, 1)                      BN scale (or ones)
    sh_ref   : (Cout, 1)                      BN shift (+ folded bias if no act)
    o_ref    : (nb, Cout or Cin+Cout, H*W)
    xflat_ref: (nb, Cin, left + H*W + s_max)  flat images, lane-aligned interior
    xcol_ref : (K*K*Cin_pad, nb*H*W)          im2col scratch (compute dtype)
    """
    HW = H * W
    pad = (K - 1) // 2
    shift_max = pad * W + pad
    left = xflat_ref.shape[-1] - HW - shift_max    # 128-aligned interior offset

    # Stage each image at a lane-aligned offset (unmasked stores).  Only the
    # two shift_max-wide halo slices are zeroed (cheap); the interior is fully
    # overwritten every step.  NOTE: zeroing every step (not at program_id==0)
    # is deliberate — under a "parallel" grid each TensorCore has its own
    # scratch, so a one-shot init is unsafe.
    zero_halo = jnp.zeros((cin, shift_max), xflat_ref.dtype)
    for n in range(nb):
        xflat_ref[n, :, pl.ds(left - shift_max, shift_max)] = zero_halo
        xflat_ref[n, :, pl.ds(left + HW, shift_max)] = zero_halo
        xflat_ref[n, :, pl.ds(left, HW)] = x_ref[n]

    # Output-position indices for boundary masking (hoisted out of tap loop).
    lane = jax.lax.broadcasted_iota(jnp.int32, (1, HW), 1)
    w_idx = (lane & (W - 1)) if (W & (W - 1) == 0) else (lane % W)

    n_pad_rows = cin_pad - cin
    if n_pad_rows:
        zero_rows = jnp.zeros((n_pad_rows, nb * HW), xcol_ref.dtype)

    # im2col: rows [t*Cin_pad, t*Cin_pad + Cin) hold tap t; pad rows stay zero
    # (matching weight columns are zero), so every tap store is tile-aligned.
    for kh in range(K):
        dh = kh - pad
        for kw in range(K):
            dw = kw - pad
            d = dh * W + dw
            t = kh * K + kw
            conds = []
            if dh < 0:
                conds.append(lane >= (-dh) * W)
            if dh > 0:
                conds.append(lane < (H - dh) * W)
            if dw < 0:
                conds.append(w_idx >= -dw)
            if dw > 0:
                conds.append(w_idx < W - dw)
            valid = functools.reduce(lambda a, b: a & b, conds) if conds else None
            if n_pad_rows:
                xcol_ref[pl.ds(t * cin_pad + cin, n_pad_rows), :] = zero_rows
            for n in range(nb):
                slab = xflat_ref[n, :, pl.ds(left + d, HW)]       # (Cin, HW)
                if valid is not None:
                    slab = jnp.where(valid, slab, 0.0)
                xcol_ref[pl.ds(t * cin_pad, cin), pl.ds(n * HW, HW)] = (
                    slab.astype(xcol_ref.dtype))

    # One fat MXU matmul (lane axis = nb*H*W), f32 accumulation + fused epilogue.
    y = jnp.dot(w_ref[...], xcol_ref[...],
                preferred_element_type=jnp.float32)               # (Cout, nb*HW)
    if add_bias:
        y = y + b_ref[...]
    y = _apply_activation(y, activation, gelu_approximate)
    y = y * sc_ref[...] + sh_ref[...]      # BN FMA (bias folded in when no act)
    y = y.astype(o_ref.dtype)

    for n in range(nb):
        y_n = y[:, n * HW:(n + 1) * HW]    # lane-tile-aligned register slice
        if cat_input:
            o_ref[n, pl.ds(0, cin), :] = x_ref[n].astype(o_ref.dtype)
            # TODO(synk): for cin % 8 != 0 this store straddles one sublane
            # tile; route it via an aligned VMEM scratch + local DMA if needed.
            o_ref[n, pl.ds(cin, cout), :] = y_n
        else:
            o_ref[n] = y_n


def conv_layer_forward(x_nchw, weight, bias, *, activation=None,
                       bn_scale=None, bn_shift=None, cat_input=False,
                       compute_dtype=jnp.float32, gelu_approximate=None,
                       num_blocks=None):
    """Replicates _ConvLayer.forward: conv -> activation -> BN -> optional cat.

    x_nchw: (N, Cin, H, W); weight: (Cout, Cin, K, K); bias: (Cout,).
    bn_scale/bn_shift are eval-mode folded BatchNorm params
    (gamma/sqrt(var+eps), beta - mean*scale); pass None for no BN.
    """
    N, Cin, H, W = x_nchw.shape
    Cout, Cin_w, K, K2 = weight.shape
    assert Cin == Cin_w and K == K2
    assert K % 2 == 1, "stride-1 'same' padding assumes odd kernel_size"
    if not activation:
        activation = None
    if gelu_approximate is None:
        gelu_approximate = _is_v5e()

    HW = H * W
    pad = (K - 1) // 2
    shift_max = pad * W + pad
    left = _round_up(max(shift_max, 1), 128)      # lane-aligned interior offset
    xflat_width = left + HW + shift_max
    C_total = Cin + Cout if cat_input else Cout

    sub = _sublane_multiple(compute_dtype)
    cin_pad = _round_up(Cin, sub)
    R = K * K * cin_pad

    x_itemsize = jnp.dtype(x_nchw.dtype).itemsize
    c_itemsize = jnp.dtype(compute_dtype).itemsize
    per_image_bytes = Cin * xflat_width * x_itemsize + R * HW * c_itemsize
    if num_blocks is None:
        num_blocks = _pick_num_blocks(N, per_image_bytes)
    assert N % num_blocks == 0, (N, num_blocks)
    nb = N // num_blocks

    # Layout glue: minor-dim reshape (free) + tiny one-time weight repack with
    # per-tap channel zero-padding to the sublane multiple.
    x_flat = x_nchw.reshape(N, Cin, HW)
    w_r = jnp.transpose(weight, (0, 2, 3, 1)).reshape(Cout, K * K, Cin)
    if cin_pad > Cin:
        w_r = jnp.pad(w_r, ((0, 0), (0, 0), (0, cin_pad - Cin)))
    w_mat = w_r.reshape(Cout, R).astype(compute_dtype)

    b = bias.reshape(Cout, 1).astype(jnp.float32)
    if bn_scale is None:
        sc = jnp.ones((Cout, 1), jnp.float32)
        sh = jnp.zeros((Cout, 1), jnp.float32)
    else:
        sc = bn_scale.reshape(Cout, 1).astype(jnp.float32)
        sh = bn_shift.reshape(Cout, 1).astype(jnp.float32)
    add_bias = activation is not None
    if not add_bias:
        # No activation between conv and BN: fold the bias into the shift,
        # y = (W @ Xcol) * sc + (b * sc + sh).
        sh = sh + b * sc

    kern = functools.partial(
        _conv_layer_kernel, H=H, W=W, K=K, nb=nb, cin=Cin, cin_pad=cin_pad,
        cout=Cout, activation=activation, add_bias=add_bias,
        gelu_approximate=gelu_approximate, cat_input=cat_input)

    out_flat = pl.pallas_call(
        kern,
        out_shape=jax.ShapeDtypeStruct((N, C_total, HW), x_nchw.dtype),
        grid_spec=pltpu.PrefetchScalarGridSpec(
            num_scalar_prefetch=0,
            grid=(num_blocks,),
            in_specs=[
                pl.BlockSpec((nb, Cin, HW), lambda i: (i, 0, 0)),
                pl.BlockSpec((Cout, R), lambda i: (0, 0)),
                pl.BlockSpec((Cout, 1), lambda i: (0, 0)),
                pl.BlockSpec((Cout, 1), lambda i: (0, 0)),
                pl.BlockSpec((Cout, 1), lambda i: (0, 0)),
            ],
            out_specs=pl.BlockSpec((nb, C_total, HW), lambda i: (i, 0, 0)),
            scratch_shapes=[
                pltpu.VMEM((nb, Cin, xflat_width), x_nchw.dtype),
                pltpu.VMEM((R, nb * HW), compute_dtype),
            ],
        ),
        compiler_params=pltpu.CompilerParams(
            dimension_semantics=("parallel",),
            vmem_limit_bytes=32 * 1024 * 1024,
        ),
    )(x_flat, w_mat, b, sc, sh)

    return out_flat.reshape(N, C_total, H, W)


if __name__ == "__main__":
    key = jax.random.PRNGKey(0)
    kx, kw, kb, kg, kbt, km, kv = jax.random.split(key, 7)

    # Module configs exercised: kernel_size=3, activation='relu', bn=True,
    # cat_input=True (all branches), plus a plain conv (folded-bias epilogue).
    N, Cin, H, W = 2, 4, 16, 16
    Cout, K = 8, 3
    eps = 1e-5

    x = jax.random.normal(kx, (N, Cin, H, W), jnp.float32)
    weight = 0.1 * jax.random.normal(kw, (Cout, Cin, K, K), jnp.float32)
    bias = 0.1 * jax.random.normal(kb, (Cout,), jnp.float32)

    # Deterministic eval-mode BatchNorm2d params folded to scale/shift.
    gamma = 1.0 + 0.1 * jax.random.normal(kg, (Cout,), jnp.float32)
    beta = 0.1 * jax.random.normal(kbt, (Cout,), jnp.float32)
    run_mean = 0.1 * jax.random.normal(km, (Cout,), jnp.float32)
    run_var = jax.nn.softplus(jax.random.normal(kv, (Cout,), jnp.float32)) + 0.5
    bn_scale = gamma / jnp.sqrt(run_var + eps)
    bn_shift = beta - run_mean * bn_scale

    def conv_ref(xv):
        y = jax.lax.conv_general_dilated(
            xv, weight, window_strides=(1, 1),
            padding=((K // 2, K // 2), (K // 2, K // 2)),
            dimension_numbers=("NCHW", "OIHW", "NCHW"))
        return y + bias[None, :, None, None]

    # --- config 1: conv -> relu -> bn, cat_input=True -----------------------
    out1 = conv_layer_forward(x, weight, bias, activation="relu",
                              bn_scale=bn_scale, bn_shift=bn_shift,
                              cat_input=True)
    out1 = jax.block_until_ready(out1)
    y1 = jnp.maximum(conv_ref(x), 0.0)
    y1 = y1 * bn_scale[None, :, None, None] + bn_shift[None, :, None, None]
    ref1 = jnp.concatenate([x, y1], axis=1)
    assert out1.shape == (N, Cin + Cout, H, W), out1.shape
    err1 = float(jnp.max(jnp.abs(out1 - ref1)))
    assert jnp.allclose(out1, ref1, atol=1e-4, rtol=1e-4), err1

    # --- config 2: bare conv (no activation / bn / cat) ---------------------
    out2 = conv_layer_forward(x, weight, bias)
    out2 = jax.block_until_ready(out2)
    ref2 = conv_ref(x)
    assert out2.shape == (N, Cout, H, W), out2.shape
    err2 = float(jnp.max(jnp.abs(out2 - ref2)))
    assert jnp.allclose(out2, ref2, atol=1e-4, rtol=1e-4), err2

    print("KERNEL_OK")
</pallas_src>

<mosaic_0001>
module attributes {stable_mosaic.version = 11 : i64} {
  func.func @_conv_layer_kernel(%arg0: i32, %arg1: memref<2x4x256xf32, #tpu.memory_space<vmem>>, %arg2: memref<8x72xf32, #tpu.memory_space<vmem>>, %arg3: memref<8x1xf32, #tpu.memory_space<vmem>>, %arg4: memref<8x1xf32, #tpu.memory_space<vmem>>, %arg5: memref<8x1xf32, #tpu.memory_space<vmem>>, %arg6: memref<2x12x256xf32, #tpu.memory_space<vmem>>, %arg7: memref<2x4x401xf32, #tpu.memory_space<vmem>>, %arg8: memref<72x512xf32, #tpu.memory_space<vmem>>) attributes {dimension_semantics = [#tpu.dimension_semantics<parallel>], iteration_bounds = array<i64: 1>, scalar_prefetch = 0 : i64, scratch_operands = 2 : i64, tpu.core_type = #tpu.core_type<tc>, window_params = [{transform_indices = @transform_0, window_bounds = array<i64: 2, 4, 256>}, {pipeline_mode = #tpu.pipeline_mode<synchronous>, transform_indices = @transform_1, window_bounds = array<i64: 8, 72>}, {pipeline_mode = #tpu.pipeline_mode<synchronous>, transform_indices = @transform_2, window_bounds = array<i64: 8, 1>}, {pipeline_mode = #tpu.pipeline_mode<synchronous>, transform_indices = @transform_3, window_bounds = array<i64: 8, 1>}, {pipeline_mode = #tpu.pipeline_mode<synchronous>, transform_indices = @transform_4, window_bounds = array<i64: 8, 1>}, {transform_indices = @transform_5, window_bounds = array<i64: 2, 12, 256>}]} {
    %cst = arith.constant 0.000000e+00 : f32
    %0 = vector.broadcast %cst : f32 to vector<4x17xf32>
    %c0 = arith.constant 0 : index
    %c0_0 = arith.constant 0 : index
    %c111 = arith.constant 111 : index
    %1 = vector.load %arg7[%c0, %c0_0, %c111] : memref<2x4x401xf32, #tpu.memory_space<vmem>>, vector<1x4x17xf32>
    %2 = vector.shape_cast %1 : vector<1x4x17xf32> to vector<4x17xf32>
    %3 = vector.shape_cast %0 : vector<4x17xf32> to vector<1x4x17xf32>
    tpu.vector_store %arg7[%c0, %c0_0, %c111], %3 {strides = array<i32>} : memref<2x4x401xf32, #tpu.memory_space<vmem>>, vector<1x4x17xf32>,
    %c0_1 = arith.constant 0 : index
    %c0_2 = arith.constant 0 : index
    %c384 = arith.constant 384 : index
    %4 = vector.load %arg7[%c0_1, %c0_2, %c384] : memref<2x4x401xf32, #tpu.memory_space<vmem>>, vector<1x4x17xf32>
    %5 = vector.shape_cast %4 : vector<1x4x17xf32> to vector<4x17xf32>
    %6 = vector.shape_cast %0 : vector<4x17xf32> to vector<1x4x17xf32>
    tpu.vector_store %arg7[%c0_1, %c0_2, %c384], %6 {strides = array<i32>} : memref<2x4x401xf32, #tpu.memory_space<vmem>>, vector<1x4x17xf32>,
    %c0_3 = arith.constant 0 : index
    %c0_4 = arith.constant 0 : index
    %c0_5 = arith.constant 0 : index
    %7 = vector.load %arg1[%c0_3, %c0_4, %c0_5] : memref<2x4x256xf32, #tpu.memory_space<vmem>>, vector<1x4x256xf32>
    %8 = vector.shape_cast %7 : vector<1x4x256xf32> to vector<4x256xf32>
    %c0_6 = arith.constant 0 : index
    %c0_7 = arith.constant 0 : index
    %c128 = arith.constant 128 : index
    %9 = vector.load %arg7[%c0_6, %c0_7, %c128] : memref<2x4x401xf32, #tpu.memory_space<vmem>>, vector<1x4x256xf32>
    %10 = vector.shape_cast %9 : vector<1x4x256xf32> to vector<4x256xf32>
    %11 = vector.shape_cast %8 : vector<4x256xf32> to vector<1x4x256xf32>
    tpu.vector_store %arg7[%c0_6, %c0_7, %c128], %11 {strides = array<i32>} : memref<2x4x401xf32, #tpu.memory_space<vmem>>, vector<1x4x256xf32>,
    %c1 = arith.constant 1 : index
    %c0_8 = arith.constant 0 : index
    %c111_9 = arith.constant 111 : index
    %12 = vector.load %arg7[%c1, %c0_8, %c111_9] : memref<2x4x401xf32, #tpu.memory_space<vmem>>, vector<1x4x17xf32>
    %13 = vector.shape_cast %12 : vector<1x4x17xf32> to vector<4x17xf32>
    %14 = vector.shape_cast %0 : vector<4x17xf32> to vector<1x4x17xf32>
    tpu.vector_store %arg7[%c1, %c0_8, %c111_9], %14 {strides = array<i32>} : memref<2x4x401xf32, #tpu.memory_space<vmem>>, vector<1x4x17xf32>,
    %c1_10 = arith.constant 1 : index
    %c0_11 = arith.constant 0 : index
    %c384_12 = arith.constant 384 : index
    %15 = vector.load %arg7[%c1_10, %c0_11, %c384_12] : memref<2x4x401xf32, #tpu.memory_space<vmem>>, vector<1x4x17xf32>
    %16 = vector.shape_cast %15 : vector<1x4x17xf32> to vector<4x17xf32>
    %17 = vector.shape_cast %0 : vector<4x17xf32> to vector<1x4x17xf32>
    tpu.vector_store %arg7[%c1_10, %c0_11, %c384_12], %17 {strides = array<i32>} : memref<2x4x401xf32, #tpu.memory_space<vmem>>, vector<1x4x17xf32>,
    %c1_13 = arith.constant 1 : index
    %c0_14 = arith.constant 0 : index
    %c0_15 = arith.constant 0 : index
    %18 = vector.load %arg1[%c1_13, %c0_14, %c0_15] : memref<2x4x256xf32, #tpu.memory_space<vmem>>, vector<1x4x256xf32>
    %19 = vector.shape_cast %18 : vector<1x4x256xf32> to vector<4x256xf32>
    %c1_16 = arith.constant 1 : index
    %c0_17 = arith.constant 0 : index
    %c128_18 = arith.constant 128 : index
    %20 = vector.load %arg7[%c1_16, %c0_17, %c128_18] : memref<2x4x401xf32, #tpu.memory_space<vmem>>, vector<1x4x256xf32>
    %21 = vector.shape_cast %20 : vector<1x4x256xf32> to vector<4x256xf32>
    %22 = vector.shape_cast %19 : vector<4x256xf32> to vector<1x4x256xf32>
    tpu.vector_store %arg7[%c1_16, %c0_17, %c128_18], %22 {strides = array<i32>} : memref<2x4x401xf32, #tpu.memory_space<vmem>>, vector<1x4x256xf32>,
    %23 = tpu.iota {dimensions = array<i32: 1>} : vector<1x256xi32>
    %c15_i32 = arith.constant 15 : i32
    %24 = vector.broadcast %c15_i32 : i32 to vector<1x256xi32>
    %25 = arith.andi %23, %24 : vector<1x256xi32>
    %cst_19 = arith.constant 0.000000e+00 : f32
    %26 = vector.broadcast %cst_19 : f32 to vector<4x512xf32>
    %c16_i32 = arith.constant 16 : i32
    %27 = vector.broadcast %c16_i32 : i32 to vector<1x256xi32>
    %28 = arith.cmpi sge, %23, %27 : vector<1x256xi32>
    %c1_i32 = arith.constant 1 : i32
    %29 = vector.broadcast %c1_i32 : i32 to vector<1x256xi32>
    %30 = arith.cmpi sge, %25, %29 : vector<1x256xi32>
    %31 = arith.andi %28, %30 : vector<1x256xi1>
    %c4 = arith.constant 4 : index
    %c0_20 = arith.constant 0 : index
    %32 = vector.load %arg8[%c4, %c0_20] : memref<72x512xf32, #tpu.memory_space<vmem>>, vector<4x512xf32>
    tpu.vector_store %arg8[%c4, %c0_20], %26 {strides = array<i32>} : memref<72x512xf32, #tpu.memory_space<vmem>>, vector<4x512xf32>,
    %c0_21 = arith.constant 0 : index
    %c0_22 = arith.constant 0 : index
    %c111_23 = arith.constant 111 : index
    %33 = vector.load %arg7[%c0_21, %c0_22, %c111_23] : memref<2x4x401xf32, #tpu.memory_space<vmem>>, vector<1x4x256xf32>
    %34 = vector.shape_cast %33 : vector<1x4x256xf32> to vector<4x256xf32>
    %cst_24 = arith.constant 0.000000e+00 : f32
    %35 = vector.shape_cast %31 : vector<1x256xi1> to vector<1x256xi1>
    %36 = vector.broadcast %35 : vector<1x256xi1> to vector<4x256xi1>
    %37 = vector.broadcast %cst_24 : f32 to vector<4x256xf32>
    %38 = arith.select %36, %34, %37 : vector<4x256xi1>, vector<4x256xf32>
    %c0_25 = arith.constant 0 : index
    %c0_26 = arith.constant 0 : index
    %39 = vector.load %arg8[%c0_25, %c0_26] : memref<72x512xf32, #tpu.memory_space<vmem>>, vector<4x256xf32>
    tpu.vector_store %arg8[%c0_25, %c0_26], %38 {strides = array<i32>} : memref<72x512xf32, #tpu.memory_space<vmem>>, vector<4x256xf32>,
    %c1_27 = arith.constant 1 : index
    %c0_28 = arith.constant 0 : index
    %c111_29 = arith.constant 111 : index
    %40 = vector.load %arg7[%c1_27, %c0_28, %c111_29] : memref<2x4x401xf32, #tpu.memory_space<vmem>>, vector<1x4x256xf32>
    %41 = vector.shape_cast %40 : vector<1x4x256xf32> to vector<4x256xf32>
    %cst_30 = arith.constant 0.000000e+00 : f32
    %42 = vector.shape_cast %31 : vector<1x256xi1> to vector<1x256xi1>
    %43 = vector.broadcast %42 : vector<1x256xi1> to vector<4x256xi1>
    %44 = vector.broadcast %cst_30 : f32 to vector<4x256xf32>
    %45 = arith.select %43, %41, %44 : vector<4x256xi1>, vector<4x256xf32>
    %c0_31 = arith.constant 0 : index
    %c256 = arith.constant 256 : index
    %46 = vector.load %arg8[%c0_31, %c256] : memref<72x512xf32, #tpu.memory_space<vmem>>, vector<4x256xf32>
    tpu.vector_store %arg8[%c0_31, %c256], %45 {strides = array<i32>} : memref<72x512xf32, #tpu.memory_space<vmem>>, vector<4x256xf32>,
    %c16_i32_32 = arith.constant 16 : i32
    %47 = vector.broadcast %c16_i32_32 : i32 to vector<1x256xi32>
    %48 = arith.cmpi sge, %23, %47 : vector<1x256xi32>
    %c12 = arith.constant 12 : index
    %c0_33 = arith.constant 0 : index
    %49 = vector.load %arg8[%c12, %c0_33] : memref<72x512xf32, #tpu.memory_space<vmem>>, vector<4x512xf32>
    tpu.vector_store %arg8[%c12, %c0_33], %26 {strides = array<i32>} : memref<72x512xf32, #tpu.memory_space<vmem>>, vector<4x512xf32>,
    %c0_34 = arith.constant 0 : index
    %c0_35 = arith.constant 0 : index
    %c112 = arith.constant 112 : index
    %50 = vector.load %arg7[%c0_34, %c0_35, %c112] : memref<2x4x401xf32, #tpu.memory_space<vmem>>, vector<1x4x256xf32>
    %51 = vector.shape_cast %50 : vector<1x4x256xf32> to vector<4x256xf32>
    %cst_36 = arith.constant 0.000000e+00 : f32
    %52 = vector.shape_cast %48 : vector<1x256xi1> to vector<1x256xi1>
    %53 = vector.broadcast %52 : vector<1x256xi1> to vector<4x256xi1>
    %54 = vector.broadcast %cst_36 : f32 to vector<4x256xf32>
    %55 = arith.select %53, %51, %54 : vector<4x256xi1>, vector<4x256xf32>
    %c8 = arith.constant 8 : index
    %c0_37 = arith.constant 0 : index
    %56 = vector.load %arg8[%c8, %c0_37] : memref<72x512xf32, #tpu.memory_space<vmem>>, vector<4x256xf32>
    tpu.vector_store %arg8[%c8, %c0_37], %55 {strides = array<i32>} : memref<72x512xf32, #tpu.memory_space<vmem>>, vector<4x256xf32>,
    %c1_38 = arith.constant 1 : index
    %c0_39 = arith.constant 0 : index
    %c112_40 = arith.constant 112 : index
    %57 = vector.load %arg7[%c1_38, %c0_39, %c112_40] : memref<2x4x401xf32, #tpu.memory_space<vmem>>, vector<1x4x256xf32>
    %58 = vector.shape_cast %57 : vector<1x4x256xf32> to vector<4x256xf32>
    %cst_41 = arith.constant 0.000000e+00 : f32
    %59 = vector.shape_cast %48 : vector<1x256xi1> to vector<1x256xi1>
    %60 = vector.broadcast %59 : vector<1x256xi1> to vector<4x256xi1>
    %61 = vector.broadcast %cst_41 : f32 to vector<4x256xf32>
    %62 = arith.select %60, %58, %61 : vector<4x256xi1>, vector<4x256xf32>
    %c8_42 = arith.constant 8 : index
    %c256_43 = arith.constant 256 : index
    %63 = vector.load %arg8[%c8_42, %c256_43] : memref<72x512xf32, #tpu.memory_space<vmem>>, vector<4x256xf32>
    tpu.vector_store %arg8[%c8_42, %c256_43], %62 {strides = array<i32>} : memref<72x512xf32, #tpu.memory_space<vmem>>, vector<4x256xf32>,
    %c16_i32_44 = arith.constant 16 : i32
    %64 = vector.broadcast %c16_i32_44 : i32 to vector<1x256xi32>
    %65 = arith.cmpi sge, %23, %64 : vector<1x256xi32>
    %c15_i32_45 = arith.constant 15 : i32
    %66 = vector.broadcast %c15_i32_45 : i32 to vector<1x256xi32>
    %67 = arith.cmpi slt, %25, %66 : vector<1x256xi32>
    %68 = arith.andi %65, %67 : vector<1x256xi1>
    %c20 = arith.constant 20 : index
    %c0_46 = arith.constant 0 : index
    %69 = vector.load %arg8[%c20, %c0_46] : memref<72x512xf32, #tpu.memory_space<vmem>>, vector<4x512xf32>
    tpu.vector_store %arg8[%c20, %c0_46], %26 {strides = array<i32>} : memref<72x512xf32, #tpu.memory_space<vmem>>, vector<4x512xf32>,
    %c0_47 = arith.constant 0 : index
    %c0_48 = arith.constant 0 : index
    %c113 = arith.constant 113 : index
    %70 = vector.load %arg7[%c0_47, %c0_48, %c113] : memref<2x4x401xf32, #tpu.memory_space<vmem>>, vector<1x4x256xf32>
    %71 = vector.shape_cast %70 : vector<1x4x256xf32> to vector<4x256xf32>
    %cst_49 = arith.constant 0.000000e+00 : f32
    %72 = vector.shape_cast %68 : vector<1x256xi1> to vector<1x256xi1>
    %73 = vector.broadcast %72 : vector<1x256xi1> to vector<4x256xi1>
    %74 = vector.broadcast %cst_49 : f32 to vector<4x256xf32>
    %75 = arith.select %73, %71, %74 : vector<4x256xi1>, vector<4x256xf32>
    %c16 = arith.constant 16 : index
    %c0_50 = arith.constant 0 : index
    %76 = vector.load %arg8[%c16, %c0_50] : memref<72x512xf32, #tpu.memory_space<vmem>>, vector<4x256xf32>
    tpu.vector_store %arg8[%c16, %c0_50], %75 {strides = array<i32>} : memref<72x512xf32, #tpu.memory_space<vmem>>, vector<4x256xf32>,
    %c1_51 = arith.constant 1 : index
    %c0_52 = arith.constant 0 : index
    %c113_53 = arith.constant 113 : index
    %77 = vector.load %arg7[%c1_51, %c0_52, %c113_53] : memref<2x4x401xf32, #tpu.memory_space<vmem>>, vector<1x4x256xf32>
    %78 = vector.shape_cast %77 : vector<1x4x256xf32> to vector<4x256xf32>
    %cst_54 = arith.constant 0.000000e+00 : f32
    %79 = vector.shape_cast %68 : vector<1x256xi1> to vector<1x256xi1>
    %80 = vector.broadcast %79 : vector<1x256xi1> to vector<4x256xi1>
    %81 = vector.broadcast %cst_54 : f32 to vector<4x256xf32>
    %82 = arith.select %80, %78, %81 : vector<4x256xi1>, vector<4x256xf32>
    %c16_55 = arith.constant 16 : index
    %c256_56 = arith.constant 256 : index
    %83 = vector.load %arg8[%c16_55, %c256_56] : memref<72x512xf32, #tpu.memory_space<vmem>>, vector<4x256xf32>
    tpu.vector_store %arg8[%c16_55, %c256_56], %82 {strides = array<i32>} : memref<72x512xf32, #tpu.memory_space<vmem>>, vector<4x256xf32>,
    %c1_i32_57 = arith.constant 1 : i32
    %84 = vector.broadcast %c1_i32_57 : i32 to vector<1x256xi32>
    %85 = arith.cmpi sge, %25, %84 : vector<1x256xi32>
    %c28 = arith.constant 28 : index
    %c0_58 = arith.constant 0 : index
    %86 = vector.load %arg8[%c28, %c0_58] : memref<72x512xf32, #tpu.memory_space<vmem>>, vector<4x512xf32>
    tpu.vector_store %arg8[%c28, %c0_58], %26 {strides = array<i32>} : memref<72x512xf32, #tpu.memory_space<vmem>>, vector<4x512xf32>,
    %c0_59 = arith.constant 0 : index
    %c0_60 = arith.constant 0 : index
    %c127 = arith.constant 127 : index
    %87 = vector.load %arg7[%c0_59, %c0_60, %c127] : memref<2x4x401xf32, #tpu.memory_space<vmem>>, vector<1x4x256xf32>
    %88 = vector.shape_cast %87 : vector<1x4x256xf32> to vector<4x256xf32>
    %cst_61 = arith.constant 0.000000e+00 : f32
    %89 = vector.shape_cast %85 : vector<1x256xi1> to vector<1x256xi1>
    %90 = vector.broadcast %89 : vector<1x256xi1> to vector<4x256xi1>
    %91 = vector.broadcast %cst_61 : f32 to vector<4x256xf32>
    %92 = arith.select %90, %88, %91 : vector<4x256xi1>, vector<4x256xf32>
    %c24 = arith.constant 24 : index
    %c0_62 = arith.constant 0 : index
    %93 = vector.load %arg8[%c24, %c0_62] : memref<72x512xf32, #tpu.memory_space<vmem>>, vector<4x256xf32>
    tpu.vector_store %arg8[%c24, %c0_62], %92 {strides = array<i32>} : memref<72x512xf32, #tpu.memory_space<vmem>>, vector<4x256xf32>,
    %c1_63 = arith.constant 1 : index
    %c0_64 = arith.constant 0 : index
    %c127_65 = arith.constant 127 : index
    %94 = vector.load %arg7[%c1_63, %c0_64, %c127_65] : memref<2x4x401xf32, #tpu.memory_space<vmem>>, vector<1x4x256xf32>
    %95 = vector.shape_cast %94 : vector<1x4x256xf32> to vector<4x256xf32>
    %cst_66 = arith.constant 0.000000e+00 : f32
    %96 = vector.shape_cast %85 : vector<1x256xi1> to vector<1x256xi1>
    %97 = vector.broadcast %96 : vector<1x256xi1> to vector<4x256xi1>
    %98 = vector.broadcast %cst_66 : f32 to vector<4x256xf32>
    %99 = arith.select %97, %95, %98 : vector<4x256xi1>, vector<4x256xf32>
    %c24_67 = arith.constant 24 : index
    %c256_68 = arith.constant 256 : index
    %100 = vector.load %arg8[%c24_67, %c256_68] : memref<72x512xf32, #tpu.memory_space<vmem>>, vector<4x256xf32>
    tpu.vector_store %arg8[%c24_67, %c256_68], %99 {strides = array<i32>} : memref<72x512xf32, #tpu.memory_space<vmem>>, vector<4x256xf32>,
    %c36 = arith.constant 36 : index
    %c0_69 = arith.constant 0 : index
    %101 = vector.load %arg8[%c36, %c0_69] : memref<72x512xf32, #tpu.memory_space<vmem>>, vector<4x512xf32>
    tpu.vector_store %arg8[%c36, %c0_69], %26 {strides = array<i32>} : memref<72x512xf32, #tpu.memory_space<vmem>>, vector<4x512xf32>,
    %c0_70 = arith.constant 0 : index
    %c0_71 = arith.constant 0 : index
    %c128_72 = arith.constant 128 : index
    %102 = vector.load %arg7[%c0_70, %c0_71, %c128_72] : memref<2x4x401xf32, #tpu.memory_space<vmem>>, vector<1x4x256xf32>
    %103 = vector.shape_cast %102 : vector<1x4x256xf32> to vector<4x256xf32>
    %c32 = arith.constant 32 : index
    %c0_73 = arith.constant 0 : index
    %104 = vector.load %arg8[%c32, %c0_73] : memref<72x512xf32, #tpu.memory_space<vmem>>, vector<4x256xf32>
    tpu.vector_store %arg8[%c32, %c0_73], %103 {strides = array<i32>} : memref<72x512xf32, #tpu.memory_space<vmem>>, vector<4x256xf32>,
    %c1_74 = arith.constant 1 : index
    %c0_75 = arith.constant 0 : index
    %c128_76 = arith.constant 128 : index
    %105 = vector.load %arg7[%c1_74, %c0_75, %c128_76] : memref<2x4x401xf32, #tpu.memory_space<vmem>>, vector<1x4x256xf32>
    %106 = vector.shape_cast %105 : vector<1x4x256xf32> to vector<4x256xf32>
    %c32_77 = arith.constant 32 : index
    %c256_78 = arith.constant 256 : index
    %107 = vector.load %arg8[%c32_77, %c256_78] : memref<72x512xf32, #tpu.memory_space<vmem>>, vector<4x256xf32>
    tpu.vector_store %arg8[%c32_77, %c256_78], %106 {strides = array<i32>} : memref<72x512xf32, #tpu.memory_space<vmem>>, vector<4x256xf32>,
    %c15_i32_79 = arith.constant 15 : i32
    %108 = vector.broadcast %c15_i32_79 : i32 to vector<1x256xi32>
    %109 = arith.cmpi slt, %25, %108 : vector<1x256xi32>
    %c44 = arith.constant 44 : index
    %c0_80 = arith.constant 0 : index
    %110 = vector.load %arg8[%c44, %c0_80] : memref<72x512xf32, #tpu.memory_space<vmem>>, vector<4x512xf32>
    tpu.vector_store %arg8[%c44, %c0_80], %26 {strides = array<i32>} : memref<72x512xf32, #tpu.memory_space<vmem>>, vector<4x512xf32>,
    %c0_81 = arith.constant 0 : index
    %c0_82 = arith.constant 0 : index
    %c129 = arith.constant 129 : index
    %111 = vector.load %arg7[%c0_81, %c0_82, %c129] : memref<2x4x401xf32, #tpu.memory_space<vmem>>, vector<1x4x256xf32>
    %112 = vector.shape_cast %111 : vector<1x4x256xf32> to vector<4x256xf32>
    %cst_83 = arith.constant 0.000000e+00 : f32
    %113 = vector.shape_cast %109 : vector<1x256xi1> to vector<1x256xi1>
    %114 = vector.broadcast %113 : vector<1x256xi1> to vector<4x256xi1>
    %115 = vector.broadcast %cst_83 : f32 to vector<4x256xf32>
    %116 = arith.select %114, %112, %115 : vector<4x256xi1>, vector<4x256xf32>
    %c40 = arith.constant 40 : index
    %c0_84 = arith.constant 0 : index
    %117 = vector.load %arg8[%c40, %c0_84] : memref<72x512xf32, #tpu.memory_space<vmem>>, vector<4x256xf32>
    tpu.vector_store %arg8[%c40, %c0_84], %116 {strides = array<i32>} : memref<72x512xf32, #tpu.memory_space<vmem>>, vector<4x256xf32>,
    %c1_85 = arith.constant 1 : index
    %c0_86 = arith.constant 0 : index
    %c129_87 = arith.constant 129 : index
    %118 = vector.load %arg7[%c1_85, %c0_86, %c129_87] : memref<2x4x401xf32, #tpu.memory_space<vmem>>, vector<1x4x256xf32>
    %119 = vector.shape_cast %118 : vector<1x4x256xf32> to vector<4x256xf32>
    %cst_88 = arith.constant 0.000000e+00 : f32
    %120 = vector.shape_cast %109 : vector<1x256xi1> to vector<1x256xi1>
    %121 = vector.broadcast %120 : vector<1x256xi1> to vector<4x256xi1>
    %122 = vector.broadcast %cst_88 : f32 to vector<4x256xf32>
    %123 = arith.select %121, %119, %122 : vector<4x256xi1>, vector<4x256xf32>
    %c40_89 = arith.constant 40 : index
    %c256_90 = arith.constant 256 : index
    %124 = vector.load %arg8[%c40_89, %c256_90] : memref<72x512xf32, #tpu.memory_space<vmem>>, vector<4x256xf32>
    tpu.vector_store %arg8[%c40_89, %c256_90], %123 {strides = array<i32>} : memref<72x512xf32, #tpu.memory_space<vmem>>, vector<4x256xf32>,
    %c240_i32 = arith.constant 240 : i32
    %125 = vector.broadcast %c240_i32 : i32 to vector<1x256xi32>
    %126 = arith.cmpi slt, %23, %125 : vector<1x256xi32>
    %c1_i32_91 = arith.constant 1 : i32
    %127 = vector.broadcast %c1_i32_91 : i32 to vector<1x256xi32>
    %128 = arith.cmpi sge, %25, %127 : vector<1x256xi32>
    %129 = arith.andi %126, %128 : vector<1x256xi1>
    %c52 = arith.constant 52 : index
    %c0_92 = arith.constant 0 : index
    %130 = vector.load %arg8[%c52, %c0_92] : memref<72x512xf32, #tpu.memory_space<vmem>>, vector<4x512xf32>
    tpu.vector_store %arg8[%c52, %c0_92], %26 {strides = array<i32>} : memref<72x512xf32, #tpu.memory_space<vmem>>, vector<4x512xf32>,
    %c0_93 = arith.constant 0 : index
    %c0_94 = arith.constant 0 : index
    %c143 = arith.constant 143 : index
    %131 = vector.load %arg7[%c0_93, %c0_94, %c143] : memref<2x4x401xf32, #tpu.memory_space<vmem>>, vector<1x4x256xf32>
    %132 = vector.shape_cast %131 : vector<1x4x256xf32> to vector<4x256xf32>
    %cst_95 = arith.constant 0.000000e+00 : f32
    %133 = vector.shape_cast %129 : vector<1x256xi1> to vector<1x256xi1>
    %134 = vector.broadcast %133 : vector<1x256xi1> to vector<4x256xi1>
    %135 = vector.broadcast %cst_95 : f32 to vector<4x256xf32>
    %136 = arith.select %134, %132, %135 : vector<4x256xi1>, vector<4x256xf32>
    %c48 = arith.constant 48 : index
    %c0_96 = arith.constant 0 : index
    %137 = vector.load %arg8[%c48, %c0_96] : memref<72x512xf32, #tpu.memory_space<vmem>>, vector<4x256xf32>
    tpu.vector_store %arg8[%c48, %c0_96], %136 {strides = array<i32>} : memref<72x512xf32, #tpu.memory_space<vmem>>, vector<4x256xf32>,
    %c1_97 = arith.constant 1 : index
    %c0_98 = arith.constant 0 : index
    %c143_99 = arith.constant 143 : index
    %138 = vector.load %arg7[%c1_97, %c0_98, %c143_99] : memref<2x4x401xf32, #tpu.memory_space<vmem>>, vector<1x4x256xf32>
    %139 = vector.shape_cast %138 : vector<1x4x256xf32> to vector<4x256xf32>
    %cst_100 = arith.constant 0.000000e+00 : f32
    %140 = vector.shape_cast %129 : vector<1x256xi1> to vector<1x256xi1>
    %141 = vector.broadcast %140 : vector<1x256xi1> to vector<4x256xi1>
    %142 = vector.broadcast %cst_100 : f32 to vector<4x256xf32>
    %143 = arith.select %141, %139, %142 : vector<4x256xi1>, vector<4x256xf32>
    %c48_101 = arith.constant 48 : index
    %c256_102 = arith.constant 256 : index
    %144 = vector.load %arg8[%c48_101, %c256_102] : memref<72x512xf32, #tpu.memory_space<vmem>>, vector<4x256xf32>
    tpu.vector_store %arg8[%c48_101, %c256_102], %143 {strides = array<i32>} : memref<72x512xf32, #tpu.memory_space<vmem>>, vector<4x256xf32>,
    %c240_i32_103 = arith.constant 240 : i32
    %145 = vector.broadcast %c240_i32_103 : i32 to vector<1x256xi32>
    %146 = arith.cmpi slt, %23, %145 : vector<1x256xi32>
    %c60 = arith.constant 60 : index
    %c0_104 = arith.constant 0 : index
    %147 = vector.load %arg8[%c60, %c0_104] : memref<72x512xf32, #tpu.memory_space<vmem>>, vector<4x512xf32>
    tpu.vector_store %arg8[%c60, %c0_104], %26 {strides = array<i32>} : memref<72x512xf32, #tpu.memory_space<vmem>>, vector<4x512xf32>,
    %c0_105 = arith.constant 0 : index
    %c0_106 = arith.constant 0 : index
    %c144 = arith.constant 144 : index
    %148 = vector.load %arg7[%c0_105, %c0_106, %c144] : memref<2x4x401xf32, #tpu.memory_space<vmem>>, vector<1x4x256xf32>
    %149 = vector.shape_cast %148 : vector<1x4x256xf32> to vector<4x256xf32>
    %cst_107 = arith.constant 0.000000e+00 : f32
    %150 = vector.shape_cast %146 : vector<1x256xi1> to vector<1x256xi1>
    %151 = vector.broadcast %150 : vector<1x256xi1> to vector<4x256xi1>
    %152 = vector.broadcast %cst_107 : f32 to vector<4x256xf32>
    %153 = arith.select %151, %149, %152 : vector<4x256xi1>, vector<4x256xf32>
    %c56 = arith.constant 56 : index
    %c0_108 = arith.constant 0 : index
    %154 = vector.load %arg8[%c56, %c0_108] : memref<72x512xf32, #tpu.memory_space<vmem>>, vector<4x256xf32>
    tpu.vector_store %arg8[%c56, %c0_108], %153 {strides = array<i32>} : memref<72x512xf32, #tpu.memory_space<vmem>>, vector<4x256xf32>,
    %c1_109 = arith.constant 1 : index
    %c0_110 = arith.constant 0 : index
    %c144_111 = arith.constant 144 : index
    %155 = vector.load %arg7[%c1_109, %c0_110, %c144_111] : memref<2x4x401xf32, #tpu.memory_space<vmem>>, vector<1x4x256xf32>
    %156 = vector.shape_cast %155 : vector<1x4x256xf32> to vector<4x256xf32>
    %cst_112 = arith.constant 0.000000e+00 : f32
    %157 = vector.shape_cast %146 : vector<1x256xi1> to vector<1x256xi1>
    %158 = vector.broadcast %157 : vector<1x256xi1> to vector<4x256xi1>
    %159 = vector.broadcast %cst_112 : f32 to vector<4x256xf32>
    %160 = arith.select %158, %156, %159 : vector<4x256xi1>, vector<4x256xf32>
    %c56_113 = arith.constant 56 : index
    %c256_114 = arith.constant 256 : index
    %161 = vector.load %arg8[%c56_113, %c256_114] : memref<72x512xf32, #tpu.memory_space<vmem>>, vector<4x256xf32>
    tpu.vector_store %arg8[%c56_113, %c256_114], %160 {strides = array<i32>} : memref<72x512xf32, #tpu.memory_space<vmem>>, vector<4x256xf32>,
    %c240_i32_115 = arith.constant 240 : i32
    %162 = vector.broadcast %c240_i32_115 : i32 to vector<1x256xi32>
    %163 = arith.cmpi slt, %23, %162 : vector<1x256xi32>
    %c15_i32_116 = arith.constant 15 : i32
    %164 = vector.broadcast %c15_i32_116 : i32 to vector<1x256xi32>
    %165 = arith.cmpi slt, %25, %164 : vector<1x256xi32>
    %166 = arith.andi %163, %165 : vector<1x256xi1>
    %c68 = arith.constant 68 : index
    %c0_117 = arith.constant 0 : index
    %167 = vector.load %arg8[%c68, %c0_117] : memref<72x512xf32, #tpu.memory_space<vmem>>, vector<4x512xf32>
    tpu.vector_store %arg8[%c68, %c0_117], %26 {strides = array<i32>} : memref<72x512xf32, #tpu.memory_space<vmem>>, vector<4x512xf32>,
    %c0_118 = arith.constant 0 : index
    %c0_119 = arith.constant 0 : index
    %c145 = arith.constant 145 : index
    %168 = vector.load %arg7[%c0_118, %c0_119, %c145] : memref<2x4x401xf32, #tpu.memory_space<vmem>>, vector<1x4x256xf32>
    %169 = vector.shape_cast %168 : vector<1x4x256xf32> to vector<4x256xf32>
    %cst_120 = arith.constant 0.000000e+00 : f32
    %170 = vector.shape_cast %166 : vector<1x256xi1> to vector<1x256xi1>
    %171 = vector.broadcast %170 : vector<1x256xi1> to vector<4x256xi1>
    %172 = vector.broadcast %cst_120 : f32 to vector<4x256xf32>
    %173 = arith.select %171, %169, %172 : vector<4x256xi1>, vector<4x256xf32>
    %c64 = arith.constant 64 : index
    %c0_121 = arith.constant 0 : index
    %174 = vector.load %arg8[%c64, %c0_121] : memref<72x512xf32, #tpu.memory_space<vmem>>, vector<4x256xf32>
    tpu.vector_store %arg8[%c64, %c0_121], %173 {strides = array<i32>} : memref<72x512xf32, #tpu.memory_space<vmem>>, vector<4x256xf32>,
    %c1_122 = arith.constant 1 : index
    %c0_123 = arith.constant 0 : index
    %c145_124 = arith.constant 145 : index
    %175 = vector.load %arg7[%c1_122, %c0_123, %c145_124] : memref<2x4x401xf32, #tpu.memory_space<vmem>>, vector<1x4x256xf32>
    %176 = vector.shape_cast %175 : vector<1x4x256xf32> to vector<4x256xf32>
    %cst_125 = arith.constant 0.000000e+00 : f32
    %177 = vector.shape_cast %166 : vector<1x256xi1> to vector<1x256xi1>
    %178 = vector.broadcast %177 : vector<1x256xi1> to vector<4x256xi1>
    %179 = vector.broadcast %cst_125 : f32 to vector<4x256xf32>
    %180 = arith.select %178, %176, %179 : vector<4x256xi1>, vector<4x256xf32>
    %c64_126 = arith.constant 64 : index
    %c256_127 = arith.constant 256 : index
    %181 = vector.load %arg8[%c64_126, %c256_127] : memref<72x512xf32, #tpu.memory_space<vmem>>, vector<4x256xf32>
    tpu.vector_store %arg8[%c64_126, %c256_127], %180 {strides = array<i32>} : memref<72x512xf32, #tpu.memory_space<vmem>>, vector<4x256xf32>,
    %c0_128 = arith.constant 0 : index
    %c0_129 = arith.constant 0 : index
    %182 = vector.load %arg2[%c0_128, %c0_129] : memref<8x72xf32, #tpu.memory_space<vmem>>, vector<8x72xf32>
    %c0_130 = arith.constant 0 : index
    %c0_131 = arith.constant 0 : index
    %183 = vector.load %arg8[%c0_130, %c0_131] : memref<72x512xf32, #tpu.memory_space<vmem>>, vector<72x512xf32>
    %cst_132 = arith.constant dense<0.000000e+00> : vector<8x512xf32>
    %184 = tpu.matmul %182, %183, %cst_132 {dimension_numbers = #tpu.dot_dimension_numbers<[1], [0], [0], [1], [0, 0, 1, 1], [], []>} : vector<8x72xf32>, vector<72x512xf32>, vector<8x512xf32> -> vector<8x512xf32>
    %c0_133 = arith.constant 0 : index
    %c0_134 = arith.constant 0 : index
    %185 = vector.load %arg3[%c0_133, %c0_134] : memref<8x1xf32, #tpu.memory_space<vmem>>, vector<8x1xf32>
    %186 = vector.broadcast %185 : vector<8x1xf32> to vector<8x512xf32>
    %187 = arith.addf %184, %186 : vector<8x512xf32>
    %cst_135 = arith.constant 0.000000e+00 : f32
    %188 = vector.broadcast %cst_135 : f32 to vector<8x512xf32>
    %189 = arith.maximumf %187, %188 : vector<8x512xf32>
    %c0_136 = arith.constant 0 : index
    %c0_137 = arith.constant 0 : index
    %190 = vector.load %arg4[%c0_136, %c0_137] : memref<8x1xf32, #tpu.memory_space<vmem>>, vector<8x1xf32>
    %191 = vector.broadcast %190 : vector<8x1xf32> to vector<8x512xf32>
    %192 = arith.mulf %189, %191 : vector<8x512xf32>
    %c0_138 = arith.constant 0 : index
    %c0_139 = arith.constant 0 : index
    %193 = vector.load %arg5[%c0_138, %c0_139] : memref<8x1xf32, #tpu.memory_space<vmem>>, vector<8x1xf32>
    %194 = vector.broadcast %193 : vector<8x1xf32> to vector<8x512xf32>
    %195 = arith.addf %192, %194 : vector<8x512xf32>
    %196 = vector.extract_strided_slice %195 {offsets = [0, 0], sizes = [8, 256], strides = [1, 1]} : vector<8x512xf32> to vector<8x256xf32>
    %c0_140 = arith.constant 0 : index
    %c0_141 = arith.constant 0 : index
    %c0_142 = arith.constant 0 : index
    %197 = vector.load %arg1[%c0_140, %c0_141, %c0_142] : memref<2x4x256xf32, #tpu.memory_space<vmem>>, vector<1x4x256xf32>
    %198 = vector.shape_cast %197 : vector<1x4x256xf32> to vector<4x256xf32>
    %c0_143 = arith.constant 0 : index
    %c0_144 = arith.constant 0 : index
    %c0_145 = arith.constant 0 : index
    %199 = vector.load %arg6[%c0_143, %c0_144, %c0_145] : memref<2x12x256xf32, #tpu.memory_space<vmem>>, vector<1x4x256xf32>
    %200 = vector.shape_cast %199 : vector<1x4x256xf32> to vector<4x256xf32>
    %201 = vector.shape_cast %198 : vector<4x256xf32> to vector<1x4x256xf32>
    tpu.vector_store %arg6[%c0_143, %c0_144, %c0_145], %201 {strides = array<i32>} : memref<2x12x256xf32, #tpu.memory_space<vmem>>, vector<1x4x256xf32>,
    %c0_146 = arith.constant 0 : index
    %c4_147 = arith.constant 4 : index
    %c0_148 = arith.constant 0 : index
    %202 = vector.load %arg6[%c0_146, %c4_147, %c0_148] : memref<2x12x256xf32, #tpu.memory_space<vmem>>, vector<1x8x256xf32>
    %203 = vector.shape_cast %202 : vector<1x8x256xf32> to vector<8x256xf32>
    %204 = vector.shape_cast %196 : vector<8x256xf32> to vector<1x8x256xf32>
    tpu.vector_store %arg6[%c0_146, %c4_147, %c0_148], %204 {strides = array<i32>} : memref<2x12x256xf32, #tpu.memory_space<vmem>>, vector<1x8x256xf32>,
    %205 = vector.extract_strided_slice %195 {offsets = [0, 256], sizes = [8, 256], strides = [1, 1]} : vector<8x512xf32> to vector<8x256xf32>
    %c1_149 = arith.constant 1 : index
    %c0_150 = arith.constant 0 : index
    %c0_151 = arith.constant 0 : index
    %206 = vector.load %arg1[%c1_149, %c0_150, %c0_151] : memref<2x4x256xf32, #tpu.memory_space<vmem>>, vector<1x4x256xf32>
    %207 = vector.shape_cast %206 : vector<1x4x256xf32> to vector<4x256xf32>
    %c1_152 = arith.constant 1 : index
    %c0_153 = arith.constant 0 : index
    %c0_154 = arith.constant 0 : index
    %208 = vector.load %arg6[%c1_152, %c0_153, %c0_154] : memref<2x12x256xf32, #tpu.memory_space<vmem>>, vector<1x4x256xf32>
    %209 = vector.shape_cast %208 : vector<1x4x256xf32> to vector<4x256xf32>
    %210 = vector.shape_cast %207 : vector<4x256xf32> to vector<1x4x256xf32>
    tpu.vector_store %arg6[%c1_152, %c0_153, %c0_154], %210 {strides = array<i32>} : memref<2x12x256xf32, #tpu.memory_space<vmem>>, vector<1x4x256xf32>,
    %c1_155 = arith.constant 1 : index
    %c4_156 = arith.constant 4 : index
    %c0_157 = arith.constant 0 : index
    %211 = vector.load %arg6[%c1_155, %c4_156, %c0_157] : memref<2x12x256xf32, #tpu.memory_space<vmem>>, vector<1x8x256xf32>
    %212 = vector.shape_cast %211 : vector<1x8x256xf32> to vector<8x256xf32>
    %213 = vector.shape_cast %205 : vector<8x256xf32> to vector<1x8x256xf32>
    tpu.vector_store %arg6[%c1_155, %c4_156, %c0_157], %213 {strides = array<i32>} : memref<2x12x256xf32, #tpu.memory_space<vmem>>, vector<1x8x256xf32>,
    return
  }
  func.func @transform_0(%arg0: i32) -> (i32, i32, i32) {
    %c0_i32 = arith.constant 0 : i32
    %c0_i32_0 = arith.constant 0 : i32
    %c0_i32_1 = arith.constant 0 : i32
    return %arg0, %c0_i32, %c0_i32_0 : i32, i32, i32
  }
  func.func @transform_1(%arg0: i32) -> (i32, i32) {
    %c0_i32 = arith.constant 0 : i32
    %c0_i32_0 = arith.constant 0 : i32
    %c0_i32_1 = arith.constant 0 : i32
    return %c0_i32, %c0_i32_0 : i32, i32
  }
  func.func @transform_2(%arg0: i32) -> (i32, i32) {
    %c0_i32 = arith.constant 0 : i32
    %c0_i32_0 = arith.constant 0 : i32
    %c0_i32_1 = arith.constant 0 : i32
    return %c0_i32, %c0_i32_0 : i32, i32
  }
  func.func @transform_3(%arg0: i32) -> (i32, i32) {
    %c0_i32 = arith.constant 0 : i32
    %c0_i32_0 = arith.constant 0 : i32
    %c0_i32_1 = arith.constant 0 : i32
    return %c0_i32, %c0_i32_0 : i32, i32
  }
  func.func @transform_4(%arg0: i32) -> (i32, i32) {
    %c0_i32 = arith.constant 0 : i32
    %c0_i32_0 = arith.constant 0 : i32
    %c0_i32_1 = arith.constant 0 : i32
    return %c0_i32, %c0_i32_0 : i32, i32
  }
  func.func @transform_5(%arg0: i32) -> (i32, i32, i32) {
    %c0_i32 = arith.constant 0 : i32
    %c0_i32_0 = arith.constant 0 : i32
    %c0_i32_1 = arith.constant 0 : i32
    return %arg0, %c0_i32, %c0_i32_0 : i32, i32, i32
  }
}

</mosaic_0001>

<bundles_post_ra>
// kernel: tpu_custom_call.1
= control target key start
LH: loop header
LB: loop body
LE: loop exit
PB: predicated region body
PF: predicated region fallthrough
CT: control target
= control target key end

     0   :  { %vm20_vm0 = vcmask 1044344   ;;  %vm22_vm1 = vcmask 134144   ;;  %v753_v2 = vmov 0.0   ;;  %s754_s29 = smov 17   ;;  %s755_s30 = smov 16   ;;  %v762_v25 = vmov 0   ;;  %s1016_s0 = inlined_call_operand.vmem [shape: f32[2,4,256], index: 0, kind: input, shape index: {}]   ;;  %s1017_s5 = inlined_call_operand.vmem [shape: f32[2,12,256], index: 5, kind: output, shape index: {}]   ;;  %s1018_s3 = inlined_call_operand.vmem [shape: f32[8,1], index: 3, kind: input, shape index: {}]   ;;  %s1019_s2 = inlined_call_operand.vmem [shape: f32[8,1], index: 2, kind: input, shape index: {}]   ;;  %s1020_s4 = inlined_call_operand.vmem [shape: f32[8,1], index: 4, kind: input, shape index: {}]   ;;  %s1021_s1 = inlined_call_operand.vmem [shape: f32[8,72], index: 1, kind: input, shape index: {}]  }
   0x1   :  { %v796_v0 = vld [vmem:[%s1016_s0 + $0x8] sm:$0xff]  ;;  %v801_v1 = vld [vmem:[%s1016_s0] sm:$0xff]  ;;  %27 = vst.msk [vmem:[#allocation2 + $0x10] sm:$0xf] %vm20_vm0, %v753_v2  ;;  %21 = vst.msk [vmem:[#allocation2] sm:$0xf] %vm20_vm0, %v753_v2  ;;  %556 = vmatprep.mubr.f32.mxu0 %v753_v2  ;;  %627 = vmatprep.mubr.f32.mxu1 %v753_v2  ;;  %v32_v29 = vlaneseq }
   0x2   :  { %43 = vst [vmem:[#allocation3] sm:$0xf0] %v753_v2  ;;  %44 = vst [vmem:[#allocation3 + $0x8] sm:$0xf0] %v753_v2  ;;  %v808_v3 = vcombine.high %v801_v1, %v801_v1  ;;  %v816_v4 = vcombine.high %v796_v0, %v796_v0  ;;  %s756_s6 = smov 15   ;;  %s757_s7 = smov 1   ;;  %748 = vset.pattern.permute.xlu1 %v762_v25  ;;  %747 = vset.pattern.permute.xlu0 %v762_v25 }
   0x3   :  { %45 = vst [vmem:[#allocation3 + $0x10] sm:$0xf0] %v753_v2  ;;  %46 = vst [vmem:[#allocation3 + $0x18] sm:$0xf0] %v753_v2  ;;  %s758_s8 = smov 127   ;;  %s759_s9 = smov 113  }
   0x4   :  { %90 = vst [vmem:[#allocation3 + $0x20] sm:$0xf0] %v753_v2  ;;  %91 = vst [vmem:[#allocation3 + $0x28] sm:$0xf0] %v753_v2  ;;  %s760_s10 = smov 112   ;;  %s761_s11 = smov 111  }
   0x5   :  { %92 = vst [vmem:[#allocation3 + $0x30] sm:$0xf0] %v753_v2  ;;  %93 = vst [vmem:[#allocation3 + $0x38] sm:$0xf0] %v753_v2  ;;  %v638_v26 = vld [vmem:[%s1018_s3] sm:$0xff]  ;;  %v860_v30 = vand.u32 127, %v32_v29 }
   0x6   :  { %141 = vst [vmem:[#allocation3 + $0x40] sm:$0xf0] %v753_v2  ;;  %142 = vst [vmem:[#allocation3 + $0x48] sm:$0xf0] %v753_v2  ;;  %v482_v27 = vld [vmem:[%s1019_s2] sm:$0xff]  ;;  %vm62_vm4 = vcmask 138240  }
   0x7   :  { %143 = vst [vmem:[#allocation3 + $0x50] sm:$0xf0] %v753_v2  ;;  %144 = vst [vmem:[#allocation3 + $0x58] sm:$0xf0] %v753_v2  ;;  %v648_v28 = vld [vmem:[%s1020_s4] sm:$0xff]  ;;  %v863_v31 = vadd.s32 128, %v860_v30 }
   0x8   :  { %188 = vst [vmem:[#allocation3 + $0x60] sm:$0xf0] %v753_v2  ;;  %189 = vst [vmem:[#allocation3 + $0x68] sm:$0xf0] %v753_v2  ;;  %v35_v34 = vand.u32 15, %v860_v30  ;;  %vm37_vm2 = vcmp.ge.s32.totalorder %v860_v30, 16 }
   0x9   :  { %190 = vst [vmem:[#allocation3 + $0x70] sm:$0xf0] %v753_v2  ;;  %191 = vst [vmem:[#allocation3 + $0x78] sm:$0xf0] %v753_v2  ;;  %v36_v35 = vand.u32 15, %v863_v31  ;;  %vm109_vm7 = vcmask 130048  }
   0xa   :  { %235 = vst [vmem:[#allocation3 + $0x80] sm:$0xf0] %v753_v2  ;;  %236 = vst [vmem:[#allocation3 + $0x88] sm:$0xf0] %v753_v2  ;;  %vm870_vm3 = vcmp.ge.s32.totalorder %v35_v34, 1  ;;  %vm160_vm8 = vcmask 121856  }
   0xb   :  { %237 = vst [vmem:[#allocation3 + $0x90] sm:$0xf0] %v753_v2  ;;  %238 = vst [vmem:[#allocation3 + $0x98] sm:$0xf0] %v753_v2  ;;  %vm874_vm5 = vcmp.ge.s32.totalorder %v36_v35, 1  ;;  %vm906_vm9 = vcmp.lt.s32.totalorder %v36_v35, 15 }
   0xc   :  { %251 = vst [vmem:[#allocation3 + $0xa0] sm:$0xf0] %v753_v2  ;;  %252 = vst [vmem:[#allocation3 + $0xa8] sm:$0xf0] %v753_v2  ;;  %vm207_vm10 = vcmask 7168   ;;  %vm921_vm11 = vcmp.lt.s32.totalorder %v35_v34, 15 }
   0xd   :  { %253 = vst [vmem:[#allocation3 + $0xb0] sm:$0xf0] %v753_v2  ;;  %254 = vst [vmem:[#allocation3 + $0xb8] sm:$0xf0] %v753_v2  ;;  %vm270_vm13 = vcmask 1039360   ;;  %vm299_vm14 = vcmp.lt.s32.totalorder %v863_v31, 240 }
   0xe   :  { %302 = vst [vmem:[#allocation3 + $0xc0] sm:$0xf0] %v753_v2  ;;  %303 = vst [vmem:[#allocation3 + $0xc8] sm:$0xf0] %v753_v2  ;;  %vm321_vm15 = vcmask 924672  }
   0xf   :  { %304 = vst [vmem:[#allocation3 + $0xd0] sm:$0xf0] %v753_v2  ;;  %305 = vst [vmem:[#allocation3 + $0xd8] sm:$0xf0] %v753_v2 }
  0x10   :  { %349 = vst [vmem:[#allocation3 + $0xe0] sm:$0xf0] %v753_v2  ;;  %350 = vst [vmem:[#allocation3 + $0xe8] sm:$0xf0] %v753_v2 }
  0x11   :  { %351 = vst [vmem:[#allocation3 + $0xf0] sm:$0xf0] %v753_v2  ;;  %352 = vst [vmem:[#allocation3 + $0xf8] sm:$0xf0] %v753_v2 }
  0x12   :  { %398 = vst [vmem:[#allocation3 + $0x100] sm:$0xf0] %v753_v2  ;;  %399 = vst [vmem:[#allocation3 + $0x108] sm:$0xf0] %v753_v2 }
  0x13   :  { %400 = vst [vmem:[#allocation3 + $0x110] sm:$0xf0] %v753_v2  ;;  %401 = vst [vmem:[#allocation3 + $0x118] sm:$0xf0] %v753_v2 }
  0x14   :  { %23 = vst.msk [vmem:[#allocation2 + $0xc] sm:$0xf] %vm22_vm1, %v753_v2  ;;  %28 = vst.msk [vmem:[#allocation2 + $0x1c] sm:$0xf] %vm22_vm1, %v753_v2  ;;  %vm368_vm1 = vcmask 916480  }
  0x15   :  { %31 = vst [vmem:[#allocation2 + $0x14] sm:$0xff] %v796_v0  ;;  %662 = vst [vmem:[%s1017_s5] sm:$0xf] %v801_v1 }
  0x16   :  { %699 = vst [vmem:[%s1017_s5 + $0x20] sm:$0xf] %v796_v0  ;;  %25 = vst [vmem:[#allocation2 + $0x4] sm:$0xff] %v801_v1 }
  0x17   :  { %243 = vst [vmem:[#allocation3 + $0x80] sm:$0xf] %v801_v1  ;;  %249 = vst [vmem:[#allocation3 + $0x90] sm:$0xf] %v796_v0 }
  0x18   :  { %663 = vst [vmem:[%s1017_s5 + $0x8] sm:$0xf] %v808_v3  ;;  %700 = vst [vmem:[%s1017_s5 + $0x28] sm:$0xf] %v816_v4 }
  0x19   :  { %244 = vst [vmem:[#allocation3 + $0x88] sm:$0xf] %v808_v3  ;;  %250 = vst [vmem:[#allocation3 + $0x98] sm:$0xf] %v816_v4 }
  0x1a   :  { %vm882_vm6 = vmand %vm37_vm2, %vm870_vm3 }
  0x1b   :  { %v256_v17 = vld [vmem:[#allocation2 + $0xc] sm:$0xf]  ;;  %v280_v18 = vld [vmem:[#allocation2 + $0x1c] sm:$0xf]  ;;  %vm139_vm12 = vmand %vm37_vm2, %vm921_vm11 }
  0x1c   :  { %v72_v5 = vld [vmem:[#allocation2 + $0x18] sm:$0xf]  ;;  %v71_v7 = vld [vmem:[#allocation2 + $0x10] sm:$0xff]  ;;  %v307_v19 = vld [vmem:[#allocation2 + $0xc] sm:$0xf] }
  0x1d   :  { %v48_v6 = vld [vmem:[#allocation2 + $0x8] sm:$0xf]  ;;  %80 = vrot.lane.b32.xlu1 %v72_v5, %s754_s29  ;;  %v47_v8 = vld [vmem:[#allocation2] sm:$0xff]  ;;  %v75_v9 = vcombine.high %v71_v7, %v71_v7  ;;  %v119_v12 = vld [vmem:[#allocation2 + $0x18] sm:$0xf] }
  0x1e   :  { %60 = vrot.lane.b32.xlu0 %v48_v6, %s754_s29  ;;  %v55_v10 = vcombine.high %v47_v8, %v47_v8  ;;  %v95_v11 = vld [vmem:[#allocation2 + $0x8] sm:$0xf]  ;;  %v170_v14 = vld [vmem:[#allocation2 + $0x18] sm:$0xf]  ;;  %v331_v20 = vld [vmem:[#allocation2 + $0x1c] sm:$0xf] }
  0x1f   :  { %v146_v13 = vld [vmem:[#allocation2 + $0x8] sm:$0xf]  ;;  %v217_v16 = vld [vmem:[#allocation2 + $0x18] sm:$0xf]  ;;  %v354_v21 = vld [vmem:[#allocation2 + $0xc] sm:$0xf] }
  0x20   :  { %v193_v15 = vld [vmem:[#allocation2 + $0x8] sm:$0xf]  ;;  %v378_v22 = vld [vmem:[#allocation2 + $0x1c] sm:$0xf]  ;;  %v403_v23 = vld [vmem:[#allocation2 + $0xc] sm:$0xf] }
  0x21   :  { %76 = vrot.lane.b32.xlu1 %v71_v7, %s754_s29  ;;  %v427_v24 = vld [vmem:[#allocation2 + $0x1c] sm:$0xf]  ;;  %vm957_vm0 = vmand %vm299_vm14, %vm874_vm5 }
  0x22   :  { %56 = vrot.lane.b32.xlu0 %v47_v8, %s754_s29 }
  0x25   :  { %78 = vrot.lane.b32.xlu1 %v75_v9, %s754_s29 }
  0x26   :  { %103 = vrot.lane.b32.xlu0 %v47_v8, %s755_s30 }
  0x29   :  { %105 = vrot.lane.b32.xlu1 %v55_v10, %s755_s30 }
  0x2a   :  { %58 = vrot.lane.b32.xlu0 %v55_v10, %s754_s29 }
  0x2d   :  { %123 = vrot.lane.b32.xlu1 %v71_v7, %s755_s30 }
  0x2e   :  { %107 = vrot.lane.b32.xlu0 %v95_v11, %s755_s30 }
  0x31   :  { %127 = vrot.lane.b32.xlu1 %v119_v12, %s755_s30 }
  0x32   :  { %125 = vrot.lane.b32.xlu0 %v75_v9, %s755_s30 }
  0x35   :  { %158 = vrot.lane.b32.xlu1 %v146_v13, %s756_s6 }
  0x36   :  { %156 = vrot.lane.b32.xlu0 %v55_v10, %s756_s6 }
  0x39   :  { %178 = vrot.lane.b32.xlu1 %v170_v14, %s756_s6 }
  0x3a   :  { %176 = vrot.lane.b32.xlu0 %v75_v9, %s756_s6 }
  0x3d   :  { %205 = vrot.lane.b32.xlu1 %v193_v15, %s757_s7 }
  0x3e   :  { %203 = vrot.lane.b32.xlu0 %v55_v10, %s757_s7 }
  0x41   :  { %225 = vrot.lane.b32.xlu1 %v217_v16, %s757_s7 }
  0x42   :  { %223 = vrot.lane.b32.xlu0 %v75_v9, %s757_s7 }
  0x45   :  { %174 = vrot.lane.b32.xlu1 %v71_v7, %s756_s6 }
  0x46   :  { %154 = vrot.lane.b32.xlu0 %v47_v8, %s756_s6 }
  0x49   :  { %221 = vrot.lane.b32.xlu1 %v71_v7, %s757_s7 }
  0x4a   :  { %201 = vrot.lane.b32.xlu0 %v47_v8, %s757_s7 }
  0x4d   :  { %268 = vrot.lane.b32.xlu1 %v256_v17, %s758_s8 }
  0x4e   :  { %266 = vrot.lane.b32.xlu0 %v808_v3, %s758_s8 }
  0x51   :  { %288 = vrot.lane.b32.xlu1 %v280_v18, %s758_s8 }
  0x52   :  { %286 = vrot.lane.b32.xlu0 %v816_v4, %s758_s8 }
  0x55   :  { %284 = vrot.lane.b32.xlu1 %v796_v0, %s758_s8 }
  0x56   :  { %264 = vrot.lane.b32.xlu0 %v801_v1, %s758_s8 }
  0x59   :  { %319 = vrot.lane.b32.xlu1 %v307_v19, %s759_s9 }
  0x5a   :  { %317 = vrot.lane.b32.xlu0 %v808_v3, %s759_s9 }
  0x5d   :  { %339 = vrot.lane.b32.xlu1 %v331_v20, %s759_s9 }
  0x5e   :  { %337 = vrot.lane.b32.xlu0 %v816_v4, %s759_s9 }
  0x61   :  { %366 = vrot.lane.b32.xlu1 %v354_v21, %s760_s10 }
  0x62   :  { %364 = vrot.lane.b32.xlu0 %v808_v3, %s760_s10 }
  0x65   :  { %386 = vrot.lane.b32.xlu1 %v378_v22, %s760_s10 }
  0x66   :  { %384 = vrot.lane.b32.xlu0 %v816_v4, %s760_s10 }
  0x69   :  { %335 = vrot.lane.b32.xlu1 %v796_v0, %s759_s9 }
  0x6a   :  { %315 = vrot.lane.b32.xlu0 %v801_v1, %s759_s9 }
  0x6d   :  { %382 = vrot.lane.b32.xlu1 %v796_v0, %s760_s10 }
  0x6e   :  { %362 = vrot.lane.b32.xlu0 %v801_v1, %s760_s10 }
  0x71   :  { %415 = vrot.lane.b32.xlu1 %v403_v23, %s761_s11 }
  0x72   :  { %413 = vrot.lane.b32.xlu0 %v808_v3, %s761_s11 }
  0x75   :  { %435 = vrot.lane.b32.xlu1 %v427_v24, %s761_s11 }
  0x76   :  { %433 = vrot.lane.b32.xlu0 %v816_v4, %s761_s11 }
  0x79   :  { %431 = vrot.lane.b32.xlu1 %v796_v0, %s761_s11 }
  0x7a   :  { %411 = vrot.lane.b32.xlu0 %v801_v1, %s761_s11 }
  0x7d   :  { %641 = vperm.xlu1 %748, %v638_v26  }
  0x7e   :  { %485 = vperm.xlu0 %747, %v482_v27  }
  0x81   :  { %651 = vperm.xlu1 %748, %v648_v28  }
  0x8f   :  { %v81_v32 = vpop.permute.xlu1 %80 }
  0x90   :  { %v61_v33 = vpop.permute.xlu0 %60 }
  0x93   :  { %v77_v36 = vpop.permute.xlu1 %76 }
  0x94   :  { %v57_v37 = vpop.permute.xlu0 %56 }
  0x97   :  { %v79_v41 = vpop.permute.xlu1 %78 }
  0x98   :  { %v104_v42 = vpop.permute.xlu0 %103  ;;  %v82_v43 = vsel %vm62_vm4, %v77_v36, %v79_v41  ;;  %v83_v44 = vsel %vm62_vm4, %v79_v41, %v81_v32 }
  0x99   :  { %v86_v45 = vsel %vm882_vm6, %v82_v43, 0.0  ;;  %v87_v46 = vsel %vm874_vm5, %v83_v44, 0.0 }
  0x9a   :  { %88 = vst [vmem:[#allocation3 + $0x10] sm:$0xf] %v86_v45  ;;  %89 = vst [vmem:[#allocation3 + $0x18] sm:$0xf] %v87_v46 }
  0x9b   :  { %v106_v47 = vpop.permute.xlu1 %105 }
  0x9c   :  { %v59_v48 = vpop.permute.xlu0 %58  ;;  %v110_v49 = vsel %vm109_vm7, %v104_v42, %v106_v47 }
  0x9d   :  { %v63_v50 = vsel %vm62_vm4, %v57_v37, %v59_v48  ;;  %v64_v51 = vsel %vm62_vm4, %v59_v48, %v61_v33  ;;  %v114_v52 = vsel %vm37_vm2, %v110_v49, 0.0  ;;  %vm488_vm4 = vcmask 588800  }
  0x9e   :  { %v67_v53 = vsel %vm882_vm6, %v63_v50, 0.0  ;;  %v68_v54 = vsel %vm874_vm5, %v64_v51, 0.0  ;;  %116 = vst [vmem:[#allocation3 + $0x20] sm:$0xf] %v114_v52 }
  0x9f   :  { %69 = vst [vmem:[#allocation3] sm:$0xf] %v67_v53  ;;  %70 = vst [vmem:[#allocation3 + $0x8] sm:$0xf] %v68_v54  ;;  %v124_v55 = vpop.permute.xlu1 %123 }
  0xa0   :  { %v108_v56 = vpop.permute.xlu0 %107 }
  0xa1   :  { %v111_v57 = vsel %vm109_vm7, %v106_v47, %v108_v56  ;;  %v449_v13 = vld [vmem:[#allocation3 + $0x18] sm:$0xff]  ;;  %v448_v17 = vld [vmem:[#allocation3 + $0x10] sm:$0xff] }
  0xa2   :  { %117 = vst [vmem:[#allocation3 + $0x28] sm:$0xf] %v111_v57 }
  0xa3   :  { %v128_v58 = vpop.permute.xlu1 %127 }
  0xa4   :  { %v126_v59 = vpop.permute.xlu0 %125 }
  0xa5   :  { %v129_v60 = vsel %vm109_vm7, %v124_v55, %v126_v59  ;;  %v130_v61 = vsel %vm109_vm7, %v126_v59, %v128_v58  ;;  %v450_v3 = vld [vmem:[#allocation3 + $0x20] sm:$0xff] }
  0xa6   :  { %v133_v62 = vsel %vm37_vm2, %v129_v60, 0.0  ;;  %136 = vst [vmem:[#allocation3 + $0x38] sm:$0xf] %v130_v61  ;;  %v446_v2 = vld [vmem:[#allocation3] sm:$0xff]  ;;  %v447_v5 = vld [vmem:[#allocation3 + $0x8] sm:$0xff]  ;;  %vm417_vm2 = vcmask 908288  }
  0xa7   :  { %135 = vst [vmem:[#allocation3 + $0x30] sm:$0xf] %v133_v62  ;;  %v159_v0 = vpop.permute.xlu1 %158  ;;  %v707_v9 = vpack.c.bf16 %v450_v3, %v446_v2  ;;  %v463_v3 = vld [vmem:[#allocation3 + $0x88] sm:$0xff] }
  0xa8   :  { %v157_v1 = vpop.permute.xlu0 %156 }
  0xa9   :  { %v162_v4 = vsel %vm160_vm8, %v157_v1, %v159_v0  ;;  %v451_v6 = vld [vmem:[#allocation3 + $0x28] sm:$0xff] }
  0xaa   :  { %v166_v7 = vsel %vm906_vm9, %v162_v4, 0.0  ;;  %v705_v8 = vpack.c.bf16 %v451_v6, %v447_v5 }
  0xab   :  { %168 = vst [vmem:[#allocation3 + $0x48] sm:$0xf] %v166_v7  ;;  %v179_v10 = vpop.permute.xlu1 %178 }
  0xac   :  { %706 = vmatprep.subr.bf16.mxu0 %v705_v8  ;;  %v177_v11 = vpop.permute.xlu0 %176 }
  0xad   :  { %v181_v12 = vsel %vm160_vm8, %v177_v11, %v179_v10  ;;  %708 = vmatpush1.bf16.msra.mxu0 %v707_v9  ;;  %v453_v14 = vld [vmem:[#allocation3 + $0x38] sm:$0xff] }
  0xae   :  { %v185_v15 = vsel %vm906_vm9, %v181_v12, 0.0  ;;  %v721_v16 = vpack.c.bf16 %v453_v14, %v449_v13  ;;  %v452_v18 = vld [vmem:[#allocation3 + $0x30] sm:$0xff]  ;;  %v465_v13 = vld [vmem:[#allocation3 + $0x98] sm:$0xff] }
  0xaf   :  { %187 = vst [vmem:[#allocation3 + $0x58] sm:$0xf] %v185_v15  ;;  %v723_v19 = vpack.c.bf16 %v452_v18, %v448_v17  ;;  %v206_v20 = vpop.permute.xlu1 %205 }
  0xb0   :  { %722 = vmatprep.subr.bf16.mxu1 %v721_v16  ;;  %v204_v21 = vpop.permute.xlu0 %203 }
  0xb1   :  { %v209_v22 = vsel %vm207_vm10, %v204_v21, %v206_v20  ;;  %724 = vmatpush1.bf16.msra.mxu1 %v723_v19  ;;  %v462_v19 = vld [vmem:[#allocation3 + $0x80] sm:$0xff]  ;;  %v464_v20 = vld [vmem:[#allocation3 + $0x90] sm:$0xff] }
  0xb2   :  { %v213_v23 = vsel %vm874_vm5, %v209_v22, 0.0  ;;  %v455_v37 = vld [vmem:[#allocation3 + $0x48] sm:$0xff] }
  0xb3   :  { %215 = vst [vmem:[#allocation3 + $0x68] sm:$0xf] %v213_v23  ;;  %v226_v24 = vpop.permute.xlu1 %225 }
  0xb4   :  { %v224_v25 = vpop.permute.xlu0 %223 }
  0xb5   :  { %v228_v27 = vsel %vm207_vm10, %v224_v25, %v226_v24 }
  0xb6   :  { %v232_v28 = vsel %vm874_vm5, %v228_v27, 0.0  ;;  %v457_v47 = vld [vmem:[#allocation3 + $0x58] sm:$0xff] }
  0xb7   :  { %234 = vst [vmem:[#allocation3 + $0x78] sm:$0xf] %v232_v28  ;;  %v175_v29 = vpop.permute.xlu1 %174 }
  0xb8   :  { %v155_v32 = vpop.permute.xlu0 %154  ;;  %v180_v33 = vsel %vm160_vm8, %v175_v29, %v177_v11 }
  0xb9   :  { %v161_v34 = vsel %vm160_vm8, %v155_v32, %v157_v1  ;;  %v184_v35 = vsel %vm139_vm12, %v180_v33, 0.0 }
  0xba   :  { %v165_v36 = vsel %vm139_vm12, %v161_v34, 0.0  ;;  %v459_v40 = vld [vmem:[#allocation3 + $0x68] sm:$0xff]  ;;  %186 = vst [vmem:[#allocation3 + $0x50] sm:$0xf] %v184_v35 }
  0xbb   :  { %167 = vst [vmem:[#allocation3 + $0x40] sm:$0xf] %v165_v36  ;;  %v709_v41 = vpack.c.bf16 %v459_v40, %v455_v37  ;;  %v222_v42 = vpop.permute.xlu1 %221 }
  0xbc   :  { %v202_v43 = vpop.permute.xlu0 %201  ;;  %v227_v44 = vsel %vm207_vm10, %v222_v42, %v224_v25 }
  0xbd   :  { %v208_v30 = vsel %vm207_vm10, %v202_v43, %v204_v21  ;;  %710 = vmatprep.subr.bf16.mxu0 %v709_v41  ;;  %v231_v45 = vsel %vm870_vm3, %v227_v44, 0.0 }
  0xbe   :  { %v212_v46 = vsel %vm870_vm3, %v208_v30, 0.0  ;;  %v461_v48 = vld [vmem:[#allocation3 + $0x78] sm:$0xff]  ;;  %233 = vst [vmem:[#allocation3 + $0x70] sm:$0xf] %v231_v45 }
  0xbf   :  { %214 = vst [vmem:[#allocation3 + $0x60] sm:$0xf] %v212_v46  ;;  %v725_v49 = vpack.c.bf16 %v461_v48, %v457_v47  ;;  %v269_v50 = vpop.permute.xlu1 %268 }
  0xc0   :  { %v267_v51 = vpop.permute.xlu0 %266 }
  0xc1   :  { %v272_v52 = vsel %vm270_vm13, %v267_v51, %v269_v50  ;;  %726 = vmatprep.subr.bf16.mxu1 %v725_v49  ;;  %v456_v60 = vld [vmem:[#allocation3 + $0x50] sm:$0xff] }
  0xc2   :  { %v276_v53 = vsel %vm906_vm9, %v272_v52, 0.0  ;;  %v454_v57 = vld [vmem:[#allocation3 + $0x40] sm:$0xff] }
  0xc3   :  { %278 = vst [vmem:[#allocation3 + $0xa8] sm:$0xf] %v276_v53  ;;  %v289_v54 = vpop.permute.xlu1 %288 }
  0xc4   :  { %v287_v55 = vpop.permute.xlu0 %286 }
  0xc5   :  { %v291_v56 = vsel %vm270_vm13, %v287_v55, %v289_v54  ;;  %v460_v61 = vld [vmem:[#allocation3 + $0x70] sm:$0xff] }
  0xc6   :  { %v295_v58 = vsel %vm906_vm9, %v291_v56, 0.0  ;;  %v458_v59 = vld [vmem:[#allocation3 + $0x60] sm:$0xff]  ;;  %v727_v0 = vpack.c.bf16 %v460_v61, %v456_v60 }
  0xc7   :  { %297 = vst [vmem:[#allocation3 + $0xb8] sm:$0xf] %v295_v58  ;;  %v711_v62 = vpack.c.bf16 %v458_v59, %v454_v57  ;;  %v285_v1 = vpop.permute.xlu1 %284 }
  0xc8   :  { %v265_v2 = vpop.permute.xlu0 %264  ;;  %v290_v4 = vsel %vm270_vm13, %v285_v1, %v287_v55  ;;  %728 = vmatpush1.bf16.msra.mxu1 %v727_v0 }
  0xc9   :  { %v271_v5 = vsel %vm270_vm13, %v265_v2, %v267_v51  ;;  %712 = vmatpush1.bf16.msra.mxu0 %v711_v62  ;;  %v294_v6 = vsel %vm921_vm11, %v290_v4, 0.0 }
  0xca   :  { %v275_v7 = vsel %vm921_vm11, %v271_v5, 0.0  ;;  %v467_v8 = vld [vmem:[#allocation3 + $0xa8] sm:$0xff]  ;;  %296 = vst [vmem:[#allocation3 + $0xb0] sm:$0xf] %v294_v6 }
  0xcb   :  { %277 = vst [vmem:[#allocation3 + $0xa0] sm:$0xf] %v275_v7  ;;  %v713_v10 = vpack.c.bf16 %v467_v8, %v463_v3  ;;  %v320_v11 = vpop.permute.xlu1 %319 }
  0xcc   :  { %v318_v12 = vpop.permute.xlu0 %317 }
  0xcd   :  { %v323_v14 = vsel %vm321_vm15, %v318_v12, %v320_v11  ;;  %714 = vmatprep.subr.bf16.mxu0 %v713_v10 }
  0xce   :  { %v327_v15 = vsel %vm957_vm0, %v323_v14, 0.0  ;;  %v469_v16 = vld [vmem:[#allocation3 + $0xb8] sm:$0xff] }
  0xcf   :  { %329 = vst [vmem:[#allocation3 + $0xc8] sm:$0xf] %v327_v15  ;;  %v729_v17 = vpack.c.bf16 %v469_v16, %v465_v13  ;;  %v340_v39 = vpop.permute.xlu1 %339 }
  0xd0   :  { %v338_v18 = vpop.permute.xlu0 %337 }
  0xd1   :  { %v342_v21 = vsel %vm321_vm15, %v338_v18, %v340_v39  ;;  %730 = vmatprep.subr.bf16.mxu1 %v729_v17  ;;  %v468_v24 = vld [vmem:[#allocation3 + $0xb0] sm:$0xff] }
  0xd2   :  { %v346_v22 = vsel %vm957_vm0, %v342_v21, 0.0  ;;  %v466_v23 = vld [vmem:[#allocation3 + $0xa0] sm:$0xff]  ;;  %v731_v27 = vpack.c.bf16 %v468_v24, %v464_v20 }
  0xd3   :  { %348 = vst [vmem:[#allocation3 + $0xd8] sm:$0xf] %v346_v22  ;;  %v715_v25 = vpack.c.bf16 %v466_v23, %v462_v19  ;;  %v367_v28 = vpop.permute.xlu1 %366 }
  0xd4   :  { %v365_v29 = vpop.permute.xlu0 %364  ;;  %732 = vmatpush1.bf16.msra.mxu1 %v731_v27 }
  0xd5   :  { %v370_v32 = vsel %vm368_vm1, %v365_v29, %v367_v28  ;;  %716 = vmatpush1.bf16.msra.mxu0 %v715_v25 }
  0xd6   :  { %v374_v33 = vsel %vm299_vm14, %v370_v32, 0.0  ;;  %v471_v45 = vld [vmem:[#allocation3 + $0xc8] sm:$0xff] }
  0xd7   :  { %376 = vst [vmem:[#allocation3 + $0xe8] sm:$0xf] %v374_v33  ;;  %v387_v34 = vpop.permute.xlu1 %386 }
  0xd8   :  { %v385_v35 = vpop.permute.xlu0 %384 }
  0xd9   :  { %v389_v36 = vsel %vm368_vm1, %v385_v35, %v387_v34 }
  0xda   :  { %v393_v37 = vsel %vm299_vm14, %v389_v36, 0.0  ;;  %v473_v52 = vld [vmem:[#allocation3 + $0xd8] sm:$0xff] }
  0xdb   :  { %395 = vst [vmem:[#allocation3 + $0xf8] sm:$0xf] %v393_v37  ;;  %v336_v40 = vpop.permute.xlu1 %335 }
  0xdc   :  { %v316_v41 = vpop.permute.xlu0 %315  ;;  %v341_v42 = vsel %vm321_vm15, %v336_v40, %v338_v18 }
  0xdd   :  { %v322_v43 = vsel %vm321_vm15, %v316_v41, %v318_v12  ;;  %v345_v44 = vsel %vm870_vm3, %v341_v42, 0.0  ;;  %v445_v12 = vld [vmem:[%s1021_s1] sm:$0xff] }
  0xde   :  { %v326_v30 = vsel %vm870_vm3, %v322_v43, 0.0  ;;  %v475_v46 = vld [vmem:[#allocation3 + $0xe8] sm:$0xff]  ;;  %347 = vst [vmem:[#allocation3 + $0xd0] sm:$0xf] %v345_v44  ;;  %vm985_vm3 = vmand %vm299_vm14, %vm906_vm9 }
  0xdf   :  { %328 = vst [vmem:[#allocation3 + $0xc0] sm:$0xf] %v326_v30  ;;  %v717_v47 = vpack.c.bf16 %v475_v46, %v471_v45  ;;  %v383_v48 = vpop.permute.xlu1 %382 }
  0xe0   :  { %v363_v49 = vpop.permute.xlu0 %362  ;;  %v388_v50 = vsel %vm368_vm1, %v383_v48, %v385_v35 }
  0xe1   :  { %v369_v51 = vsel %vm368_vm1, %v363_v49, %v365_v29  ;;  %718 = vmatprep.subr.bf16.mxu0 %v717_v47  ;;  %394 = vst [vmem:[#allocation3 + $0xf0] sm:$0xf] %v388_v50 }
  0xe2   :  { %375 = vst [vmem:[#allocation3 + $0xe0] sm:$0xf] %v369_v51  ;;  %v477_v53 = vld [vmem:[#allocation3 + $0xf8] sm:$0xff] }
  0xe3   :  { %v733_v54 = vpack.c.bf16 %v477_v53, %v473_v52  ;;  %v416_v55 = vpop.permute.xlu1 %415 }
  0xe4   :  { %v414_v56 = vpop.permute.xlu0 %413 }
  0xe5   :  { %v419_v57 = vsel %vm417_vm2, %v414_v56, %v416_v55  ;;  %734 = vmatprep.subr.bf16.mxu1 %v733_v54  ;;  %v472_v62 = vld [vmem:[#allocation3 + $0xd0] sm:$0xff] }
  0xe6   :  { %v423_v58 = vsel %vm985_vm3, %v419_v57, 0.0  ;;  %v470_v61 = vld [vmem:[#allocation3 + $0xc0] sm:$0xff] }
  0xe7   :  { %425 = vst [vmem:[#allocation3 + $0x108] sm:$0xf] %v423_v58  ;;  %v436_v59 = vpop.permute.xlu1 %435 }
  0xe8   :  { %v434_v60 = vpop.permute.xlu0 %433  ;;  %v476_v0 = vld [vmem:[#allocation3 + $0xf0] sm:$0xff] }
  0xe9   :  { %v438_v63 = vsel %vm417_vm2, %v434_v60, %v436_v59  ;;  %v474_v31 = vld [vmem:[#allocation3 + $0xe0] sm:$0xff]  ;;  %v735_v3 = vpack.c.bf16 %v476_v0, %v472_v62 }
  0xea   :  { %v442_v1 = vsel %vm985_vm3, %v438_v63, 0.0  ;;  %v719_v2 = vpack.c.bf16 %v474_v31, %v470_v61 }
  0xeb   :  { %444 = vst [vmem:[#allocation3 + $0x118] sm:$0xf] %v442_v1  ;;  %v432_v4 = vpop.permute.xlu1 %431  ;;  %736 = vmatpush1.bf16.msra.mxu1 %v735_v3 }
  0xec   :  { %720 = vmatpush1.bf16.msra.mxu0 %v719_v2  ;;  %v412_v5 = vpop.permute.xlu0 %411  ;;  %v437_v6 = vsel %vm417_vm2, %v432_v4, %v434_v60 }
  0xed   :  { %v418_v7 = vsel %vm417_vm2, %v412_v5, %v414_v56  ;;  %v441_v8 = vsel %vm921_vm11, %v437_v6, 0.0 }
  0xee   :  { %v422_v9 = vsel %vm921_vm11, %v418_v7, 0.0  ;;  %v479_v10 = vld [vmem:[#allocation3 + $0x108] sm:$0xff]  ;;  %443 = vst [vmem:[#allocation3 + $0x110] sm:$0xf] %v441_v8 }
  0xef   :  { %424 = vst [vmem:[#allocation3 + $0x100] sm:$0xf] %v422_v9  ;;  %508 = vmatprep.subr.mxu0 %v479_v10 }
  0xf2   :  { %v481_v11 = vld [vmem:[#allocation3 + $0x118] sm:$0xff] }
  0xf3   :  { %579 = vmatprep.subr.mxu1 %v481_v11 }
  0xf5   :  { %v480_v14 = vld [vmem:[#allocation3 + $0x110] sm:$0xff] }
  0xf6   :  { %v478_v13 = vld [vmem:[#allocation3 + $0x100] sm:$0xff]  ;;  %580 = vmatpush1.msra.mxu1 %v480_v14 }
  0xf7   :  { %509 = vmatpush1.msra.mxu0 %v478_v13  ;;  %697 = vmatmul.mubr.msk.f32.vlgmr.msra.gmra.mrb[0].mxu1 %vm488_vm4, %v445_v12 }
  0xf8   :  { %696 = vmatmul.mubr.msk.f32.vlgmr.msra.gmra.mrb[0].mxu0 %vm488_vm4, %v445_v12 }
  0xfc   :  { %v642_v26 = vpop.permute.xlu1 %641 }
  0xfd   :  { %v486_v15 = vpop.permute.xlu0 %485 }
 0x100   :  { %v652_v34 = vpop.permute.xlu1 %651 }
 0x1ca   :  { %v629_v17 = vpop.f32.mrb[0].mxu1 }
 0x1cb   :  { %v558_v16 = vpop.f32.mrb[0].mxu0  ;;  %v630_v18 = vadd.f32 %v629_v17, %v486_v15  ;;  %v631_v20 = vpop.f32.mrb[1].mxu1 }
 0x1cc   :  { %v559_v39 = vadd.f32 %v558_v16, %v486_v15  ;;  %v560_v19 = vpop.f32.mrb[1].mxu0  ;;  %v632_v22 = vadd.f32 %v631_v20, %v486_v15 }
 0x1cd   :  { %v561_v21 = vadd.f32 %v560_v19, %v486_v15  ;;  %v636_v24 = vmax.f32 %v630_v18, 0.0 }
 0x1ce   :  { %v634_v23 = vmax.f32 %v559_v39, 0.0  ;;  %v637_v27 = vmax.f32 %v632_v22, 0.0 }
 0x1cf   :  { %v635_v25 = vmax.f32 %v561_v21, 0.0  ;;  %v646_v29 = vmul.f32 %v642_v26, %v636_v24 }
 0x1d0   :  { %v644_v28 = vmul.f32 %v642_v26, %v634_v23  ;;  %v647_v33 = vmul.f32 %v642_v26, %v637_v27 }
 0x1d1   :  { %v645_v32 = vmul.f32 %v642_v26, %v635_v25  ;;  %v656_v36 = vadd.f32 %v652_v34, %v646_v29 }
 0x1d2   :  { %v654_v35 = vadd.f32 %v652_v34, %v644_v28  ;;  %v657_v40 = vadd.f32 %v652_v34, %v647_v33 }
 0x1d3   :  { %v655_v37 = vadd.f32 %v652_v34, %v645_v32  ;;  %v683_v42 = vrot.slane %v656_v36, 4 }
 0x1d4   :  { %v666_v41 = vrot.slane %v654_v35, 4  ;;  %v684_v44 = vrot.slane %v657_v40, 4 }
 0x1d5   :  { %v667_v43 = vrot.slane %v655_v37, 4  ;;  %701 = vst [vmem:[%s1017_s5 + $0x30] ss:$-12 sps:$4 sm:$0xff] %v683_v42  }
 0x1d6   :  { %670 = vst [vmem:[%s1017_s5 + $0x10] ss:$-12 sps:$4 sm:$0xff] %v666_v41   ;;  %702 = vst [vmem:[%s1017_s5 + $0x38] ss:$-12 sps:$4 sm:$0xff] %v684_v44  }
 0x1d7   :  { %671 = vst [vmem:[%s1017_s5 + $0x18] ss:$-12 sps:$4 sm:$0xff] %v667_v43  }

</bundles_post_ra>
